<compile_context>
chip_gen: v6e
topology: v6e:2x2x1
jax: 0.10.0
libtpu: 0.0.40
codegen_flags: <defaults>
</compile_context>

<pallas_src>
import functools

import jax
import jax.numpy as jnp
from jax.experimental import pallas as pl
from jax.experimental.pallas import tpu as pltpu


VMEM_LIMIT = 32 * 1024 * 1024    # explicit scoped-VMEM bound (safe on v5e/v6e/v7x)


def _round_up(x, m):
    return (x + m - 1) // m * m


def _cdiv(a, b):
    return -(-a // b)


def _tile_rows(m, *, max_tm=2048, min_blocks=4):
    """Pick (TM, M_padded) for tiling the patch-row dimension.

    Never a single block when M permits (v7x megacore + input/output double
    buffering), TM up to 2048 (tiny working set at K<=144), and TM chosen so
    the row padding waste stays small.
    """
    mp8 = _round_up(max(m, 8), 8)
    g = max(min_blocks, _cdiv(mp8, max_tm))      # number of row blocks
    g = max(1, min(g, mp8 // 8))                 # but blocks must hold >=8 rows
    tm = _round_up(_cdiv(mp8, g), 8)
    return tm, tm * g


def _mosaic_params():
    return pltpu.CompilerParams(dimension_semantics=("parallel",),
                                vmem_limit_bytes=VMEM_LIMIT)


def _pad_rows(a, mpad):
    m = a.shape[0]
    return a if mpad == m else jnp.pad(a, ((0, mpad - m), (0, 0)))


# -----------------------------------------------------------------------------
# Glue: im2col and weight layout conversion
# -----------------------------------------------------------------------------
def _im2col(x_nhwc, k):
    """kxk stride-1 valid patches -> (N*Ho*Wo, k*k*C), column order (dy, dx, c)."""
    n, h, w, c = x_nhwc.shape
    ho, wo = h - k + 1, w - k + 1
    cols = []
    for dy in range(k):
        for dx in range(k):
            cols.append(x_nhwc[:, dy:dy + ho, dx:dx + wo, :])
    patches = jnp.concatenate(cols, axis=-1)
    return patches.reshape(n * ho * wo, k * k * c), (n, ho, wo)


def _w_to_mat(w_oihw):
    """Torch (Cout, Cin, kH, kW) -> (kH*kW*Cin, Cout), matching _im2col order."""
    cout, cin, kh, kw = w_oihw.shape
    return jnp.transpose(w_oihw, (2, 3, 1, 0)).reshape(kh * kw * cin, cout)


# -----------------------------------------------------------------------------
# Pallas kernels
# -----------------------------------------------------------------------------
def _conv1_pool_kernel(p00_ref, p01_ref, p10_ref, p11_ref, w_ref, a_ref, o_ref):
    """Fused conv1 (3x3, no bias) + shared-slope PReLU + 2x2/2 max-pool.

    p**: (TM, 27) bf16 im2col patches of the four pool corners.
    w:   (27, 10) bf16 weights (VMEM resident).   a: (1,1) f32 slope (SMEM).
    o:   (TM, 10) bf16 pooled activation.
    """
    w = w_ref[...]
    alpha = a_ref[0, 0]

    def act(p_ref):
        y = jnp.dot(p_ref[...], w, preferred_element_type=jnp.float32)
        return jnp.where(y > 0, y, alpha * y)

    y = jnp.maximum(jnp.maximum(act(p00_ref), act(p01_ref)),
                    jnp.maximum(act(p10_ref), act(p11_ref)))
    o_ref[...] = y.astype(o_ref.dtype)


def _conv_prelu_kernel(x_ref, w_ref, b_ref, a_ref, o_ref):
    """Conv-as-matmul + bias + shared-slope PReLU (f32 epilogue)."""
    y = jnp.dot(x_ref[...], w_ref[...], preferred_element_type=jnp.float32)
    y = y + b_ref[...]
    alpha = a_ref[0, 0]
    y = jnp.where(y > 0, y, alpha * y)
    o_ref[...] = y.astype(o_ref.dtype)


def _conv3_heads_kernel(x_ref, w3_ref, b3_ref, a_ref, wh_ref, bh_ref, o_ref, *,
                        softmax2):
    """Fused conv3 (3x3) + PReLU + the three 1x1 heads (label|box|landmark).

    x:  (TM, 144) bf16 patches;  w3: (144, 32) bf16;  b3: (1, 32) f32.
    wh: (32, 16) bf16 concatenated head weights;      bh: (1, 16) f32.
    o:  (TM, 16) f32 = [label(2) | box(4) | landmark(10)].
    """
    y = jnp.dot(x_ref[...], w3_ref[...], preferred_element_type=jnp.float32)
    y = y + b3_ref[...]
    alpha = a_ref[0, 0]
    y = jnp.where(y > 0, y, alpha * y)

    h = jnp.dot(y.astype(jnp.bfloat16), wh_ref[...],
                preferred_element_type=jnp.float32)
    h = h + bh_ref[...]

    if softmax2:
        # Softmax over the 2 classification lanes only (no 128-wide reduce).
        y0 = h[:, 0:1]
        y1 = h[:, 1:2]
        m = jnp.maximum(y0, y1)
        e0 = jnp.exp(y0 - m)
        e1 = jnp.exp(y1 - m)
        inv = 1.0 / (e0 + e1)
        col = jax.lax.broadcasted_iota(jnp.int32, h.shape, 1)
        h = jnp.where(col == 0, e0 * inv, jnp.where(col == 1, e1 * inv, h))

    o_ref[...] = h.astype(o_ref.dtype)


# -----------------------------------------------------------------------------
# Kernel wrappers
# -----------------------------------------------------------------------------
def conv1_pool(x_nhwc, w1_oihw, alpha):
    """Fused conv1(3x3, stride 1, no bias) + PReLU + MaxPool2d(2,2) -> NHWC[...,10]."""
    n, h, w, c = x_nhwc.shape
    ho, wo = h - 2, w - 2
    hp, wp = ho // 2, wo // 2                     # floor (torch MaxPool2d default)
    m = n * hp * wp
    k = 9 * c

    wmat = _w_to_mat(w1_oihw).astype(jnp.bfloat16)          # (27, 10)
    cout = wmat.shape[1]

    # Stride-2 im2col patches for each of the four pool corners, column order
    # (dy, dx, c) to match _w_to_mat.
    corners = []
    for dy0 in (0, 1):
        for dx0 in (0, 1):
            cols = []
            for dy in range(3):
                for dx in range(3):
                    rs, cs = dy0 + dy, dx0 + dx
                    cols.append(x_nhwc[:, rs:rs + 2 * hp - 1:2,
                                          cs:cs + 2 * wp - 1:2, :])
            corners.append(jnp.concatenate(cols, axis=-1).reshape(m, k))

    tm, mpad = _tile_rows(m)
    corners = [_pad_rows(p, mpad) for p in corners]

    out = pl.pallas_call(
        _conv1_pool_kernel,
        grid=(mpad // tm,),
        in_specs=[pl.BlockSpec((tm, k), lambda i: (i, 0))] * 4 + [
            pl.BlockSpec((k, cout), lambda i: (0, 0)),
            pl.BlockSpec((1, 1), lambda i: (0, 0),
                         memory_space=pltpu.MemorySpace.SMEM),
        ],
        out_specs=pl.BlockSpec((tm, cout), lambda i: (i, 0)),
        out_shape=jax.ShapeDtypeStruct((mpad, cout), jnp.bfloat16),
        compiler_params=_mosaic_params(),
        cost_estimate=pl.CostEstimate(
            flops=8 * mpad * k * cout,
            transcendentals=0,
            bytes_accessed=4 * mpad * k * 2 + k * cout * 2 + mpad * cout * 2),
    )(*corners, wmat, alpha)
    return out[:m].reshape(n, hp, wp, cout)


def conv_prelu(patches, wmat, bias_row, alpha, *, out_dtype=jnp.bfloat16):
    """(M, K) @ (K, Cout) + bias + PReLU, M tiled by a parallel grid."""
    m, k = patches.shape
    cout = wmat.shape[1]
    tm, mpad = _tile_rows(m)
    patches = _pad_rows(patches, mpad)

    out = pl.pallas_call(
        _conv_prelu_kernel,
        grid=(mpad // tm,),
        in_specs=[pl.BlockSpec((tm, k), lambda i: (i, 0)),
                  pl.BlockSpec((k, cout), lambda i: (0, 0)),
                  pl.BlockSpec((1, cout), lambda i: (0, 0)),
                  pl.BlockSpec((1, 1), lambda i: (0, 0),
                               memory_space=pltpu.MemorySpace.SMEM)],
        out_specs=pl.BlockSpec((tm, cout), lambda i: (i, 0)),
        out_shape=jax.ShapeDtypeStruct((mpad, cout), out_dtype),
        compiler_params=_mosaic_params(),
        cost_estimate=pl.CostEstimate(
            flops=2 * mpad * k * cout,
            transcendentals=0,
            bytes_accessed=mpad * k * 2 + k * cout * 2 + cout * 4
                           + mpad * cout * jnp.dtype(out_dtype).itemsize),
    )(patches, wmat, bias_row, alpha)
    return out[:m]


def conv3_heads(patches, w3, b3, alpha, wh, bh, *, softmax2):
    """Fused conv3 + PReLU + the three 1x1 heads; returns (M, 16) f32."""
    m, k = patches.shape
    c3 = w3.shape[1]
    ch = wh.shape[1]
    tm, mpad = _tile_rows(m)
    patches = _pad_rows(patches, mpad)

    out = pl.pallas_call(
        functools.partial(_conv3_heads_kernel, softmax2=softmax2),
        grid=(mpad // tm,),
        in_specs=[pl.BlockSpec((tm, k), lambda i: (i, 0)),
                  pl.BlockSpec((k, c3), lambda i: (0, 0)),
                  pl.BlockSpec((1, c3), lambda i: (0, 0)),
                  pl.BlockSpec((1, 1), lambda i: (0, 0),
                               memory_space=pltpu.MemorySpace.SMEM),
                  pl.BlockSpec((c3, ch), lambda i: (0, 0)),
                  pl.BlockSpec((1, ch), lambda i: (0, 0))],
        out_specs=pl.BlockSpec((tm, ch), lambda i: (i, 0)),
        out_shape=jax.ShapeDtypeStruct((mpad, ch), jnp.float32),
        compiler_params=_mosaic_params(),
        cost_estimate=pl.CostEstimate(
            flops=2 * mpad * (k * c3 + c3 * ch),
            transcendentals=2 * mpad if softmax2 else 0,
            bytes_accessed=mpad * k * 2 + k * c3 * 2 + c3 * ch * 2
                           + (c3 + ch) * 4 + mpad * ch * 4),
    )(patches, w3, b3, alpha, wh, bh)
    return out[:m]


# -----------------------------------------------------------------------------
# Parameter init (matches PNet._initialize_weights + nn.PReLU defaults)
# -----------------------------------------------------------------------------
def _xavier_uniform(key, shape):
    cout, cin, kh, kw = shape
    fan_in, fan_out = cin * kh * kw, cout * kh * kw
    bound = (6.0 / (fan_in + fan_out)) ** 0.5
    return jax.random.uniform(key, shape, jnp.float32, -bound, bound)


def init_pnet_params(key):
    ks = jax.random.split(key, 6)
    return {
        "w1": _xavier_uniform(ks[0], (10, 3, 3, 3)),   # conv1, bias=False
        "w2": _xavier_uniform(ks[1], (16, 10, 3, 3)),
        "b2": jnp.zeros((16,), jnp.float32),
        "w3": _xavier_uniform(ks[2], (32, 16, 3, 3)),
        "b3": jnp.zeros((32,), jnp.float32),
        "w4_1": _xavier_uniform(ks[3], (2, 32, 1, 1)),
        "b4_1": jnp.zeros((2,), jnp.float32),
        "w4_2": _xavier_uniform(ks[4], (4, 32, 1, 1)),
        "b4_2": jnp.zeros((4,), jnp.float32),
        "w4_3": _xavier_uniform(ks[5], (10, 32, 1, 1)),
        "b4_3": jnp.zeros((10,), jnp.float32),
        # nn.PReLU() defaults: single shared slope, init 0.25
        "a1": jnp.full((1, 1), 0.25, jnp.float32),
        "a2": jnp.full((1, 1), 0.25, jnp.float32),
        "a3": jnp.full((1, 1), 0.25, jnp.float32),
    }


# -----------------------------------------------------------------------------
# PNet forward (matches the PyTorch module semantics)
# -----------------------------------------------------------------------------
def _pnet_forward_impl(x_nchw, params, phase):
    x = jnp.transpose(x_nchw, (0, 2, 3, 1)).astype(jnp.bfloat16)   # NHWC, bf16

    # conv1 (3->10, 3x3, no bias) + PReLU + MaxPool2d(2,2), fused in one kernel.
    y = conv1_pool(x, params["w1"], params["a1"])                   # (N,Hp,Wp,10)

    # conv2 (10->16, 3x3) + PReLU.
    w2 = _w_to_mat(params["w2"]).astype(jnp.bfloat16)               # (90, 16)
    b2 = params["b2"].reshape(1, -1).astype(jnp.float32)
    p, (n, h2, ww2) = _im2col(y, 3)
    y = conv_prelu(p, w2, b2, params["a2"]).reshape(n, h2, ww2, 16)

    # conv3 (16->32, 3x3) + PReLU fused with the three 1x1 heads.
    w3 = _w_to_mat(params["w3"]).astype(jnp.bfloat16)               # (144, 32)
    b3 = params["b3"].reshape(1, -1).astype(jnp.float32)
    wh = jnp.concatenate([_w_to_mat(params["w4_1"]),
                          _w_to_mat(params["w4_2"]),
                          _w_to_mat(params["w4_3"])],
                         axis=1).astype(jnp.bfloat16)               # (32, 16)
    bh = jnp.concatenate([params["b4_1"], params["b4_2"],
                          params["b4_3"]]).reshape(1, -1).astype(jnp.float32)
    p, (n, h3, w3s) = _im2col(y, 3)
    heads = conv3_heads(p, w3, b3, params["a3"], wh, bh,
                        softmax2=(phase != "train"))
    heads = heads.reshape(n, h3, w3s, 16)

    def to_nchw(t):
        return jnp.transpose(t, (0, 3, 1, 2))

    label = to_nchw(heads[..., 0:2])
    box = to_nchw(heads[..., 2:6])
    landmark = to_nchw(heads[..., 6:16])
    return label, box, landmark


pnet_forward = jax.jit(_pnet_forward_impl, static_argnames=("phase",))


# -----------------------------------------------------------------------------
# Pure-JAX reference with the same dtype policy (bf16 activations, f32 accum)
# -----------------------------------------------------------------------------
def _pnet_reference(x_nchw, params, phase):
    x = jnp.transpose(x_nchw, (0, 2, 3, 1)).astype(jnp.bfloat16)

    def conv(x_bf16, w_oihw, bias):
        w = jnp.transpose(w_oihw, (2, 3, 1, 0)).astype(jnp.bfloat16)   # HWIO
        y = jax.lax.conv_general_dilated(
            x_bf16, w, (1, 1), "VALID",
            dimension_numbers=("NHWC", "HWIO", "NHWC"),
            preferred_element_type=jnp.float32)
        return y if bias is None else y + bias.astype(jnp.float32)

    def prelu(y, a):
        return jnp.where(y > 0, y, a[0, 0] * y)

    y = prelu(conv(x, params["w1"], None), params["a1"])
    n, h, w, c = y.shape
    hp, wp = h // 2, w // 2
    y = y[:, :2 * hp, :2 * wp, :].reshape(n, hp, 2, wp, 2, c).max(axis=(2, 4))
    y = y.astype(jnp.bfloat16)
    y = prelu(conv(y, params["w2"], params["b2"]), params["a2"]).astype(jnp.bfloat16)
    y = prelu(conv(y, params["w3"], params["b3"]), params["a3"]).astype(jnp.bfloat16)
    label = conv(y, params["w4_1"], params["b4_1"])
    box = conv(y, params["w4_2"], params["b4_2"])
    landmark = conv(y, params["w4_3"], params["b4_3"])
    if phase != "train":
        label = jax.nn.softmax(label, axis=-1)

    def to_nchw(t):
        return jnp.transpose(t, (0, 3, 1, 2))

    return to_nchw(label), to_nchw(box), to_nchw(landmark)


# -----------------------------------------------------------------------------
if __name__ == "__main__":
    key = jax.random.PRNGKey(0)
    k_in, k_par = jax.random.split(key)
    # PNet canonical training input: (N, 3, 12, 12) NCHW
    x = jax.random.normal(k_in, (2, 3, 12, 12), jnp.float32)
    params = init_pnet_params(k_par)

    label, box, landmark = pnet_forward(x, params, phase="train")
    jax.block_until_ready((label, box, landmark))
    assert label.shape == (2, 2, 1, 1)
    assert box.shape == (2, 4, 1, 1)
    assert landmark.shape == (2, 10, 1, 1)

    # Exercise the in-kernel 2-lane softmax head path as well.
    label_t, box_t, landmark_t = pnet_forward(x, params, phase="test")
    jax.block_until_ready((label_t, box_t, landmark_t))
    assert label_t.shape == (2, 2, 1, 1)

    # Numerical sanity check against a pure-JAX reference (same dtype policy).
    ref_tr = _pnet_reference(x, params, "train")
    ref_te = _pnet_reference(x, params, "test")
    checks = list(zip((label, box, landmark), ref_tr)) + [(label_t, ref_te[0])]
    for got, want in checks:
        err = float(jnp.max(jnp.abs(got.astype(jnp.float32)
                                    - want.astype(jnp.float32))))
        assert err < 2e-2, f"max abs err {err}"

    print("KERNEL_OK")
</pallas_src>

<mosaic_0001>
module attributes {stable_mosaic.version = 11 : i64} {
  func.func @_conv1_pool_kernel(%arg0: i32, %arg1: memref<16x27xbf16, #tpu.memory_space<vmem>>, %arg2: memref<16x27xbf16, #tpu.memory_space<vmem>>, %arg3: memref<16x27xbf16, #tpu.memory_space<vmem>>, %arg4: memref<16x27xbf16, #tpu.memory_space<vmem>>, %arg5: memref<27x10xbf16, #tpu.memory_space<vmem>>, %arg6: memref<1x1xf32, #tpu.memory_space<smem>>, %arg7: memref<16x10xbf16, #tpu.memory_space<vmem>>) attributes {dimension_semantics = [#tpu.dimension_semantics<parallel>], iteration_bounds = array<i64: 4>, scalar_prefetch = 0 : i64, scratch_operands = 0 : i64, tpu.core_type = #tpu.core_type<tc>, window_params = [{transform_indices = @transform_0, window_bounds = array<i64: 16, 27>}, {transform_indices = @transform_1, window_bounds = array<i64: 16, 27>}, {transform_indices = @transform_2, window_bounds = array<i64: 16, 27>}, {transform_indices = @transform_3, window_bounds = array<i64: 16, 27>}, {pipeline_mode = #tpu.pipeline_mode<synchronous>, transform_indices = @transform_4, window_bounds = array<i64: 27, 10>}, {transform_indices = @transform_5, window_bounds = array<i64: 1, 1>}, {transform_indices = @transform_6, window_bounds = array<i64: 16, 10>}]} {
    %c0 = arith.constant 0 : index
    %c0_0 = arith.constant 0 : index
    %0 = vector.load %arg5[%c0, %c0_0] : memref<27x10xbf16, #tpu.memory_space<vmem>>, vector<27x10xbf16>
    %c0_1 = arith.constant 0 : index
    %c0_2 = arith.constant 0 : index
    %1 = memref.load %arg6[%c0_1, %c0_2] : memref<1x1xf32, #tpu.memory_space<smem>>
    %c0_3 = arith.constant 0 : index
    %c0_4 = arith.constant 0 : index
    %2 = vector.load %arg1[%c0_3, %c0_4] : memref<16x27xbf16, #tpu.memory_space<vmem>>, vector<16x27xbf16>
    %cst = arith.constant dense<0.000000e+00> : vector<16x10xf32>
    %3 = tpu.matmul %2, %0, %cst {dimension_numbers = #tpu.dot_dimension_numbers<[1], [0], [0], [1], [0, 0, 1, 1], [], []>} : vector<16x27xbf16>, vector<27x10xbf16>, vector<16x10xf32> -> vector<16x10xf32>
    %cst_5 = arith.constant 0.000000e+00 : f32
    %4 = vector.broadcast %cst_5 : f32 to vector<16x10xf32>
    %5 = arith.cmpf ogt, %3, %4 : vector<16x10xf32>
    %6 = vector.broadcast %1 : f32 to vector<16x10xf32>
    %7 = arith.mulf %6, %3 : vector<16x10xf32>
    %8 = arith.select %5, %3, %7 : vector<16x10xi1>, vector<16x10xf32>
    %c0_6 = arith.constant 0 : index
    %c0_7 = arith.constant 0 : index
    %9 = vector.load %arg2[%c0_6, %c0_7] : memref<16x27xbf16, #tpu.memory_space<vmem>>, vector<16x27xbf16>
    %cst_8 = arith.constant dense<0.000000e+00> : vector<16x10xf32>
    %10 = tpu.matmul %9, %0, %cst_8 {dimension_numbers = #tpu.dot_dimension_numbers<[1], [0], [0], [1], [0, 0, 1, 1], [], []>} : vector<16x27xbf16>, vector<27x10xbf16>, vector<16x10xf32> -> vector<16x10xf32>
    %cst_9 = arith.constant 0.000000e+00 : f32
    %11 = vector.broadcast %cst_9 : f32 to vector<16x10xf32>
    %12 = arith.cmpf ogt, %10, %11 : vector<16x10xf32>
    %13 = vector.broadcast %1 : f32 to vector<16x10xf32>
    %14 = arith.mulf %13, %10 : vector<16x10xf32>
    %15 = arith.select %12, %10, %14 : vector<16x10xi1>, vector<16x10xf32>
    %16 = arith.maximumf %8, %15 : vector<16x10xf32>
    %c0_10 = arith.constant 0 : index
    %c0_11 = arith.constant 0 : index
    %17 = vector.load %arg3[%c0_10, %c0_11] : memref<16x27xbf16, #tpu.memory_space<vmem>>, vector<16x27xbf16>
    %cst_12 = arith.constant dense<0.000000e+00> : vector<16x10xf32>
    %18 = tpu.matmul %17, %0, %cst_12 {dimension_numbers = #tpu.dot_dimension_numbers<[1], [0], [0], [1], [0, 0, 1, 1], [], []>} : vector<16x27xbf16>, vector<27x10xbf16>, vector<16x10xf32> -> vector<16x10xf32>
    %cst_13 = arith.constant 0.000000e+00 : f32
    %19 = vector.broadcast %cst_13 : f32 to vector<16x10xf32>
    %20 = arith.cmpf ogt, %18, %19 : vector<16x10xf32>
    %21 = vector.broadcast %1 : f32 to vector<16x10xf32>
    %22 = arith.mulf %21, %18 : vector<16x10xf32>
    %23 = arith.select %20, %18, %22 : vector<16x10xi1>, vector<16x10xf32>
    %c0_14 = arith.constant 0 : index
    %c0_15 = arith.constant 0 : index
    %24 = vector.load %arg4[%c0_14, %c0_15] : memref<16x27xbf16, #tpu.memory_space<vmem>>, vector<16x27xbf16>
    %cst_16 = arith.constant dense<0.000000e+00> : vector<16x10xf32>
    %25 = tpu.matmul %24, %0, %cst_16 {dimension_numbers = #tpu.dot_dimension_numbers<[1], [0], [0], [1], [0, 0, 1, 1], [], []>} : vector<16x27xbf16>, vector<27x10xbf16>, vector<16x10xf32> -> vector<16x10xf32>
    %cst_17 = arith.constant 0.000000e+00 : f32
    %26 = vector.broadcast %cst_17 : f32 to vector<16x10xf32>
    %27 = arith.cmpf ogt, %25, %26 : vector<16x10xf32>
    %28 = vector.broadcast %1 : f32 to vector<16x10xf32>
    %29 = arith.mulf %28, %25 : vector<16x10xf32>
    %30 = arith.select %27, %25, %29 : vector<16x10xi1>, vector<16x10xf32>
    %31 = arith.maximumf %23, %30 : vector<16x10xf32>
    %32 = arith.maximumf %16, %31 : vector<16x10xf32>
    %33 = arith.truncf %32 : vector<16x10xf32> to vector<16x10xbf16>
    %c0_18 = arith.constant 0 : index
    %c0_19 = arith.constant 0 : index
    %34 = vector.load %arg7[%c0_18, %c0_19] : memref<16x10xbf16, #tpu.memory_space<vmem>>, vector<16x10xbf16>
    tpu.vector_store %arg7[%c0_18, %c0_19], %33 {strides = array<i32>} : memref<16x10xbf16, #tpu.memory_space<vmem>>, vector<16x10xbf16>,
    return
  }
  func.func @transform_0(%arg0: i32) -> (i32, i32) {
    %c0_i32 = arith.constant 0 : i32
    %c0_i32_0 = arith.constant 0 : i32
    return %arg0, %c0_i32 : i32, i32
  }
  func.func @transform_1(%arg0: i32) -> (i32, i32) {
    %c0_i32 = arith.constant 0 : i32
    %c0_i32_0 = arith.constant 0 : i32
    return %arg0, %c0_i32 : i32, i32
  }
  func.func @transform_2(%arg0: i32) -> (i32, i32) {
    %c0_i32 = arith.constant 0 : i32
    %c0_i32_0 = arith.constant 0 : i32
    return %arg0, %c0_i32 : i32, i32
  }
  func.func @transform_3(%arg0: i32) -> (i32, i32) {
    %c0_i32 = arith.constant 0 : i32
    %c0_i32_0 = arith.constant 0 : i32
    return %arg0, %c0_i32 : i32, i32
  }
  func.func @transform_4(%arg0: i32) -> (i32, i32) {
    %c0_i32 = arith.constant 0 : i32
    %c0_i32_0 = arith.constant 0 : i32
    %c0_i32_1 = arith.constant 0 : i32
    return %c0_i32, %c0_i32_0 : i32, i32
  }
  func.func @transform_5(%arg0: i32) -> (i32, i32) {
    %c0_i32 = arith.constant 0 : i32
    %c0_i32_0 = arith.constant 0 : i32
    %c0_i32_1 = arith.constant 0 : i32
    return %c0_i32, %c0_i32_0 : i32, i32
  }
  func.func @transform_6(%arg0: i32) -> (i32, i32) {
    %c0_i32 = arith.constant 0 : i32
    %c0_i32_0 = arith.constant 0 : i32
    return %arg0, %c0_i32 : i32, i32
  }
}

module attributes {stable_mosaic.version = 11 : i64} {
  func.func @_conv_prelu_kernel(%arg0: i32, %arg1: memref<8x90xbf16, #tpu.memory_space<vmem>>, %arg2: memref<90x16xbf16, #tpu.memory_space<vmem>>, %arg3: memref<1x16xf32, #tpu.memory_space<vmem>>, %arg4: memref<1x1xf32, #tpu.memory_space<smem>>, %arg5: memref<8x16xbf16, #tpu.memory_space<vmem>>) attributes {dimension_semantics = [#tpu.dimension_semantics<parallel>], iteration_bounds = array<i64: 3>, scalar_prefetch = 0 : i64, scratch_operands = 0 : i64, tpu.core_type = #tpu.core_type<tc>, window_params = [{transform_indices = @transform_0, window_bounds = array<i64: 8, 90>}, {pipeline_mode = #tpu.pipeline_mode<synchronous>, transform_indices = @transform_1, window_bounds = array<i64: 90, 16>}, {pipeline_mode = #tpu.pipeline_mode<synchronous>, transform_indices = @transform_2, window_bounds = array<i64: 1, 16>}, {transform_indices = @transform_3, window_bounds = array<i64: 1, 1>}, {transform_indices = @transform_4, window_bounds = array<i64: 8, 16>}]} {
    %c0 = arith.constant 0 : index
    %c0_0 = arith.constant 0 : index
    %0 = vector.load %arg1[%c0, %c0_0] : memref<8x90xbf16, #tpu.memory_space<vmem>>, vector<8x90xbf16>
    %c0_1 = arith.constant 0 : index
    %c0_2 = arith.constant 0 : index
    %1 = vector.load %arg2[%c0_1, %c0_2] : memref<90x16xbf16, #tpu.memory_space<vmem>>, vector<90x16xbf16>
    %cst = arith.constant dense<0.000000e+00> : vector<8x16xf32>
    %2 = tpu.matmul %0, %1, %cst {dimension_numbers = #tpu.dot_dimension_numbers<[1], [0], [0], [1], [0, 0, 1, 1], [], []>} : vector<8x90xbf16>, vector<90x16xbf16>, vector<8x16xf32> -> vector<8x16xf32>
    %c0_3 = arith.constant 0 : index
    %c0_4 = arith.constant 0 : index
    %3 = vector.load %arg3[%c0_3, %c0_4] : memref<1x16xf32, #tpu.memory_space<vmem>>, vector<1x16xf32>
    %4 = vector.broadcast %3 : vector<1x16xf32> to vector<8x16xf32>
    %5 = arith.addf %2, %4 : vector<8x16xf32>
    %c0_5 = arith.constant 0 : index
    %c0_6 = arith.constant 0 : index
    %6 = memref.load %arg4[%c0_5, %c0_6] : memref<1x1xf32, #tpu.memory_space<smem>>
    %cst_7 = arith.constant 0.000000e+00 : f32
    %7 = vector.broadcast %cst_7 : f32 to vector<8x16xf32>
    %8 = arith.cmpf ogt, %5, %7 : vector<8x16xf32>
    %9 = vector.broadcast %6 : f32 to vector<8x16xf32>
    %10 = arith.mulf %9, %5 : vector<8x16xf32>
    %11 = arith.select %8, %5, %10 : vector<8x16xi1>, vector<8x16xf32>
    %12 = arith.truncf %11 : vector<8x16xf32> to vector<8x16xbf16>
    %c0_8 = arith.constant 0 : index
    %c0_9 = arith.constant 0 : index
    %13 = vector.load %arg5[%c0_8, %c0_9] : memref<8x16xbf16, #tpu.memory_space<vmem>>, vector<8x16xbf16>
    tpu.vector_store %arg5[%c0_8, %c0_9], %12 {strides = array<i32>} : memref<8x16xbf16, #tpu.memory_space<vmem>>, vector<8x16xbf16>,
    return
  }
  func.func @transform_0(%arg0: i32) -> (i32, i32) {
    %c0_i32 = arith.constant 0 : i32
    %c0_i32_0 = arith.constant 0 : i32
    return %arg0, %c0_i32 : i32, i32
  }
  func.func @transform_1(%arg0: i32) -> (i32, i32) {
    %c0_i32 = arith.constant 0 : i32
    %c0_i32_0 = arith.constant 0 : i32
    %c0_i32_1 = arith.constant 0 : i32
    return %c0_i32, %c0_i32_0 : i32, i32
  }
  func.func @transform_2(%arg0: i32) -> (i32, i32) {
    %c0_i32 = arith.constant 0 : i32
    %c0_i32_0 = arith.constant 0 : i32
    %c0_i32_1 = arith.constant 0 : i32
    return %c0_i32, %c0_i32_0 : i32, i32
  }
  func.func @transform_3(%arg0: i32) -> (i32, i32) {
    %c0_i32 = arith.constant 0 : i32
    %c0_i32_0 = arith.constant 0 : i32
    %c0_i32_1 = arith.constant 0 : i32
    return %c0_i32, %c0_i32_0 : i32, i32
  }
  func.func @transform_4(%arg0: i32) -> (i32, i32) {
    %c0_i32 = arith.constant 0 : i32
    %c0_i32_0 = arith.constant 0 : i32
    return %arg0, %c0_i32 : i32, i32
  }
}

module attributes {stable_mosaic.version = 11 : i64} {
  func.func @_conv3_heads_kernel(%arg0: i32, %arg1: memref<8x144xbf16, #tpu.memory_space<vmem>>, %arg2: memref<144x32xbf16, #tpu.memory_space<vmem>>, %arg3: memref<1x32xf32, #tpu.memory_space<vmem>>, %arg4: memref<1x1xf32, #tpu.memory_space<smem>>, %arg5: memref<32x16xbf16, #tpu.memory_space<vmem>>, %arg6: memref<1x16xf32, #tpu.memory_space<vmem>>, %arg7: memref<8x16xf32, #tpu.memory_space<vmem>>) attributes {dimension_semantics = [#tpu.dimension_semantics<parallel>], iteration_bounds = array<i64: 1>, scalar_prefetch = 0 : i64, scratch_operands = 0 : i64, tpu.core_type = #tpu.core_type<tc>, window_params = [{transform_indices = @transform_0, window_bounds = array<i64: 8, 144>}, {pipeline_mode = #tpu.pipeline_mode<synchronous>, transform_indices = @transform_1, window_bounds = array<i64: 144, 32>}, {pipeline_mode = #tpu.pipeline_mode<synchronous>, transform_indices = @transform_2, window_bounds = array<i64: 1, 32>}, {transform_indices = @transform_3, window_bounds = array<i64: 1, 1>}, {pipeline_mode = #tpu.pipeline_mode<synchronous>, transform_indices = @transform_4, window_bounds = array<i64: 32, 16>}, {pipeline_mode = #tpu.pipeline_mode<synchronous>, transform_indices = @transform_5, window_bounds = array<i64: 1, 16>}, {transform_indices = @transform_6, window_bounds = array<i64: 8, 16>}]} {
    %c0 = arith.constant 0 : index
    %c0_0 = arith.constant 0 : index
    %0 = vector.load %arg1[%c0, %c0_0] : memref<8x144xbf16, #tpu.memory_space<vmem>>, vector<8x144xbf16>
    %c0_1 = arith.constant 0 : index
    %c0_2 = arith.constant 0 : index
    %1 = vector.load %arg2[%c0_1, %c0_2] : memref<144x32xbf16, #tpu.memory_space<vmem>>, vector<144x32xbf16>
    %cst = arith.constant dense<0.000000e+00> : vector<8x32xf32>
    %2 = tpu.matmul %0, %1, %cst {dimension_numbers = #tpu.dot_dimension_numbers<[1], [0], [0], [1], [0, 0, 1, 1], [], []>} : vector<8x144xbf16>, vector<144x32xbf16>, vector<8x32xf32> -> vector<8x32xf32>
    %c0_3 = arith.constant 0 : index
    %c0_4 = arith.constant 0 : index
    %3 = vector.load %arg3[%c0_3, %c0_4] : memref<1x32xf32, #tpu.memory_space<vmem>>, vector<1x32xf32>
    %4 = vector.broadcast %3 : vector<1x32xf32> to vector<8x32xf32>
    %5 = arith.addf %2, %4 : vector<8x32xf32>
    %c0_5 = arith.constant 0 : index
    %c0_6 = arith.constant 0 : index
    %6 = memref.load %arg4[%c0_5, %c0_6] : memref<1x1xf32, #tpu.memory_space<smem>>
    %cst_7 = arith.constant 0.000000e+00 : f32
    %7 = vector.broadcast %cst_7 : f32 to vector<8x32xf32>
    %8 = arith.cmpf ogt, %5, %7 : vector<8x32xf32>
    %9 = vector.broadcast %6 : f32 to vector<8x32xf32>
    %10 = arith.mulf %9, %5 : vector<8x32xf32>
    %11 = arith.select %8, %5, %10 : vector<8x32xi1>, vector<8x32xf32>
    %12 = arith.truncf %11 : vector<8x32xf32> to vector<8x32xbf16>
    %c0_8 = arith.constant 0 : index
    %c0_9 = arith.constant 0 : index
    %13 = vector.load %arg5[%c0_8, %c0_9] : memref<32x16xbf16, #tpu.memory_space<vmem>>, vector<32x16xbf16>
    %cst_10 = arith.constant dense<0.000000e+00> : vector<8x16xf32>
    %14 = tpu.matmul %12, %13, %cst_10 {dimension_numbers = #tpu.dot_dimension_numbers<[1], [0], [0], [1], [0, 0, 1, 1], [], []>} : vector<8x32xbf16>, vector<32x16xbf16>, vector<8x16xf32> -> vector<8x16xf32>
    %c0_11 = arith.constant 0 : index
    %c0_12 = arith.constant 0 : index
    %15 = vector.load %arg6[%c0_11, %c0_12] : memref<1x16xf32, #tpu.memory_space<vmem>>, vector<1x16xf32>
    %16 = vector.broadcast %15 : vector<1x16xf32> to vector<8x16xf32>
    %17 = arith.addf %14, %16 : vector<8x16xf32>
    %c0_13 = arith.constant 0 : index
    %c0_14 = arith.constant 0 : index
    %18 = vector.load %arg7[%c0_13, %c0_14] : memref<8x16xf32, #tpu.memory_space<vmem>>, vector<8x16xf32>
    tpu.vector_store %arg7[%c0_13, %c0_14], %17 {strides = array<i32>} : memref<8x16xf32, #tpu.memory_space<vmem>>, vector<8x16xf32>,
    return
  }
  func.func @transform_0(%arg0: i32) -> (i32, i32) {
    %c0_i32 = arith.constant 0 : i32
    %c0_i32_0 = arith.constant 0 : i32
    return %arg0, %c0_i32 : i32, i32
  }
  func.func @transform_1(%arg0: i32) -> (i32, i32) {
    %c0_i32 = arith.constant 0 : i32
    %c0_i32_0 = arith.constant 0 : i32
    %c0_i32_1 = arith.constant 0 : i32
    return %c0_i32, %c0_i32_0 : i32, i32
  }
  func.func @transform_2(%arg0: i32) -> (i32, i32) {
    %c0_i32 = arith.constant 0 : i32
    %c0_i32_0 = arith.constant 0 : i32
    %c0_i32_1 = arith.constant 0 : i32
    return %c0_i32, %c0_i32_0 : i32, i32
  }
  func.func @transform_3(%arg0: i32) -> (i32, i32) {
    %c0_i32 = arith.constant 0 : i32
    %c0_i32_0 = arith.constant 0 : i32
    %c0_i32_1 = arith.constant 0 : i32
    return %c0_i32, %c0_i32_0 : i32, i32
  }
  func.func @transform_4(%arg0: i32) -> (i32, i32) {
    %c0_i32 = arith.constant 0 : i32
    %c0_i32_0 = arith.constant 0 : i32
    %c0_i32_1 = arith.constant 0 : i32
    return %c0_i32, %c0_i32_0 : i32, i32
  }
  func.func @transform_5(%arg0: i32) -> (i32, i32) {
    %c0_i32 = arith.constant 0 : i32
    %c0_i32_0 = arith.constant 0 : i32
    %c0_i32_1 = arith.constant 0 : i32
    return %c0_i32, %c0_i32_0 : i32, i32
  }
  func.func @transform_6(%arg0: i32) -> (i32, i32) {
    %c0_i32 = arith.constant 0 : i32
    %c0_i32_0 = arith.constant 0 : i32
    return %arg0, %c0_i32 : i32, i32
  }
}

</mosaic_0001>

<bundles_post_ra>
// kernel: _pnet_forward_impl.3
= control target key start
LH: loop header
LB: loop body
LE: loop exit
PB: predicated region body
PF: predicated region fallthrough
CT: control target
= control target key end

     0   :  { %s826_s23 = smov 0   ;;  %s873_s0 = inlined_call_operand.vmem [shape: bf16[64,27], index: 0, kind: input, shape index: {}]   ;;  %s874_s1 = inlined_call_operand.vmem [shape: bf16[64,27], index: 1, kind: input, shape index: {}]   ;;  %s875_s2 = inlined_call_operand.vmem [shape: bf16[64,27], index: 2, kind: input, shape index: {}]   ;;  %s876_s3 = inlined_call_operand.vmem [shape: bf16[64,27], index: 3, kind: input, shape index: {}]   ;;  %s877_s4 = inlined_call_operand.vmem [shape: bf16[27,10], index: 4, kind: input, shape index: {}]   ;;  %s878_s5 = inlined_call_operand.<no memory space> [shape: f32[1,1], index: 5, kind: input, shape index: {}]   ;;  %s879_s6 = inlined_call_operand.vmem [shape: bf16[64,10], index: 6, kind: output, shape index: {}]  }
   0x1   :  { %11 = sst [smem:[#allocation2]] %s878_s5 }
   0x2 LB: > { %s685_s24 = sadd.s32 4294967295, %s783_s23   ;;  %p689_p0 = scmp.ge.s32.totalorder %s783_s23, 1  ;;  %s783_s23 = sphi %s826_s23, %s17_s23  }
   0x3   : > { %p247_p1 = scmp.lt.s32.totalorder %s783_s23, 5 }
   0x5   : > { %p248_p2 = pnand %p689_p0, %p247_p1 }
   0x6   : > { %s690_s26 = sshll.u32 (!%p248_p2), %s685_s24, 1  ;;  %s327_s18 = sld [smem:[#allocation2]] (!%p248_p2) }
   0x7   : > { %251 = sbr.rel (%p248_p2) target bundleno = 239 (0xef), region = 44  ;;  %p293_p3 = scmp.lt.s32.totalorder (!%p248_p2), %s690_s26, 7 }
   0xc   : > { %vm350_vm0 = vcmask 1044480   ;;  %v785_v0 = vmov 0.0   ;;  %v771_v1 = vld [vmem:[%s877_s4 + $0x8] sm:$0x3f]   ;;  %vm351_vm1 = vcmask 1045504   ;;  %v786_v2 = vmov 65535  }
   0xd   : > { %728 = vmatprep.subr.bf16.mxu0 %v785_v0  ;;  %736 = vmatprep.subr.bf16.mxu1 %v785_v0  ;;  %v352_v3 = vsel %vm350_vm0, 4294967295, %v786_v2  ;;  %vm787_vm2 = vmmov 0   ;;  %s881_s26 = smov (!%p293_p3, %s690_s26), 7  ;;  %v772_v6 = vld [vmem:[%s877_s4] sm:$0xff]   ;;  %vm346_vm3 = vcmask 220160   ;;  %v400_v12 = vstv %s327_s18 }
   0xe   : > { %v353_v4 = vsel %vm351_vm1, %v352_v3, 0  ;;  %732 = vmatprep.mubr.msk.bf16.mxu0 %vm787_vm2, %v785_v0  ;;  %740 = vmatprep.mubr.msk.bf16.mxu1 %vm787_vm2, %v785_v0  ;;  %s842_s29 = sshll.u32 %s881_s26, 2  ;;  %vm590_vm12 = vcmask 76800  }
   0xf   : > { %v355_v5 = vand.u32 %v771_v1, %v353_v4  ;;  %s296_s8 = scalar_lea.vmem %s873_s0, %s842_s29  ;;  %s302_s11 = scalar_lea.vmem %s874_s1, %s842_s29 }
  0x10   : > { %v773_v7 = vld [vmem:[%s296_s8] sm:$0xff]   ;;  %s308_s14 = scalar_lea.vmem %s875_s2, %s842_s29  ;;  %s314_s17 = scalar_lea.vmem %s876_s3, %s842_s29 }
  0x11   : > { %729 = vmatpush3.bf16.msra.mxu0 %v355_v5  ;;  %737 = vmatpush3.bf16.msra.mxu1 %v355_v5  ;;  %v774_v8 = vld [vmem:[%s302_s11] sm:$0xff]   ;;  %s320_s21 = scalar_lea.vmem %s879_s6, %s842_s29 }
  0x12   : > { %730 = vmatprep.subr.bf16.mxu0 %v785_v0  ;;  %738 = vmatprep.subr.bf16.mxu1 %v785_v0  ;;  %v775_v9 = vld [vmem:[%s308_s14] sm:$0xff]  }
  0x13   : > { %v776_v10 = vld [vmem:[%s314_s17] sm:$0xff]  }
  0x15   : > { %731 = vmatpush3.bf16.msra.mxu0 %v772_v6  ;;  %739 = vmatpush3.bf16.msra.mxu1 %v772_v6 }
  0x16   : > { %744 = vmatprep.subr.bf16.mxu0 %v785_v0  ;;  %752 = vmatprep.subr.bf16.mxu1 %v785_v0 }
  0x18   : > { %733 = vmatmul.mubr.msk.bf16.vlgmr.msra.gmra.mxu0 %vm346_vm3, %v773_v7  ;;  %741 = vmatmul.mubr.msk.bf16.vlgmr.msra.gmra.mxu1 %vm346_vm3, %v774_v8 }
  0x19   : > { %745 = vmatpush3.bf16.msra.mxu0 %v355_v5  ;;  %753 = vmatpush3.bf16.msra.mxu1 %v355_v5 }
  0x1a   : > { %746 = vmatprep.subr.bf16.mxu0 %v785_v0  ;;  %754 = vmatprep.subr.bf16.mxu1 %v785_v0 }
  0x1b   : > { %748 = vmatprep.mubr.msk.bf16.mxu0 %vm787_vm2, %v785_v0  ;;  %756 = vmatprep.mubr.msk.bf16.mxu1 %vm787_vm2, %v785_v0 }
  0x1d   : > { %747 = vmatpush3.bf16.msra.mxu0 %v772_v6  ;;  %755 = vmatpush3.bf16.msra.mxu1 %v772_v6 }
  0x20   : > { %749 = vmatmul.mubr.msk.bf16.vlgmr.msra.gmra.mxu0 %vm346_vm3, %v775_v9  ;;  %757 = vmatmul.mubr.msk.bf16.vlgmr.msra.gmra.mxu1 %vm346_vm3, %v776_v10 }
  0xd8   : > { %v391_v11 = vpop.f32.mrf.mxu0  ;;  %v449_v13 = vpop.f32.mrf.mxu1 }
  0xd9   : > { %v401_v16 = vmul.f32 %v400_v12, %v391_v11  ;;  %v458_v17 = vmul.f32 %v449_v13, %v400_v12  ;;  %vm398_vm4 = vcmp.gt.f32.partialorder %v391_v11, 0.0  ;;  %vm456_vm5 = vcmp.gt.f32.partialorder %v449_v13, 0.0 }
  0xda   : > { %v734_v14 = vpop.f32.mrf.mxu0  ;;  %v742_v15 = vpop.f32.mrf.mxu1 }
  0xdb   : > { %v403_v22 = vsel %vm398_vm4, %v391_v11, %v401_v16  ;;  %v460_v23 = vsel %vm456_vm5, %v449_v13, %v458_v17 }
  0xdc   : > { %v394_v18 = vpop.f32.mrf.mxu0  ;;  %v452_v19 = vpop.f32.mrf.mxu1  ;;  %v462_v34 = vmax.f32 %v403_v22, %v460_v23 }
  0xdd   : > { %vm399_vm6 = vcmp.gt.f32.partialorder %v394_v18, 0.0  ;;  %v402_v24 = vmul.f32 %v400_v12, %v394_v18  ;;  %vm457_vm7 = vcmp.gt.f32.partialorder %v452_v19, 0.0  ;;  %v459_v25 = vmul.f32 %v452_v19, %v400_v12 }
  0xde   : > { %v735_v20 = vpop.f32.mrf.mxu0  ;;  %v743_v21 = vpop.f32.mrf.mxu1 }
  0xdf   : > { %v404_v35 = vsel %vm399_vm6, %v394_v18, %v402_v24  ;;  %v461_v36 = vsel %vm457_vm7, %v452_v19, %v459_v25 }
  0xe0   : > { %v508_v26 = vpop.f32.mrf.mxu0  ;;  %v565_v27 = vpop.f32.mrf.mxu1  ;;  %v463_v47 = vmax.f32 %v404_v35, %v461_v36 }
  0xe1   : > { %vm515_vm8 = vcmp.gt.f32.partialorder %v508_v26, 0.0  ;;  %v517_v28 = vmul.f32 %v508_v26, %v400_v12  ;;  %vm572_vm9 = vcmp.gt.f32.partialorder %v565_v27, 0.0  ;;  %v574_v29 = vmul.f32 %v565_v27, %v400_v12 }
  0xe2   : > { %v750_v30 = vpop.f32.mrf.mxu0  ;;  %v758_v31 = vpop.f32.mrf.mxu1 }
  0xe3   : > { %v519_v32 = vsel %vm515_vm8, %v508_v26, %v517_v28  ;;  %v576_v33 = vsel %vm572_vm9, %v565_v27, %v574_v29 }
  0xe4   : > { %v578_v37 = vmax.f32 %v519_v32, %v576_v33  ;;  %v511_v38 = vpop.f32.mrf.mxu0  ;;  %v568_v39 = vpop.f32.mrf.mxu1 }
  0xe5   : > { %vm516_vm10 = vcmp.gt.f32.partialorder %v511_v38, 0.0  ;;  %v518_v40 = vmul.f32 %v511_v38, %v400_v12  ;;  %vm573_vm11 = vcmp.gt.f32.partialorder %v568_v39, 0.0  ;;  %v575_v41 = vmul.f32 %v568_v39, %v400_v12 }
  0xe6   : > { %v580_v42 = vmax.f32 %v462_v34, %v578_v37  ;;  %v751_v43 = vpop.f32.mrf.mxu0  ;;  %v759_v44 = vpop.f32.mrf.mxu1 }
  0xe7   : > { %v520_v45 = vsel %vm516_vm10, %v511_v38, %v518_v40  ;;  %v577_v46 = vsel %vm573_vm11, %v568_v39, %v575_v41 }
  0xe8   : > { %v714_v48 = vpack.c.bf16 %v580_v42, %v580_v42  ;;  %v579_v49 = vmax.f32 %v520_v45, %v577_v46 }
  0xea   : > { %591 = vst.msk [vmem:[%s320_s21] sm:$0xf] %vm590_vm12, %v714_v48  ;;  %v581_v50 = vmax.f32 %v463_v47, %v579_v49 }
  0xec   : > { %v715_v51 = vpack.c.bf16 %v581_v50, %v581_v50 }
  0xee   : > { %592 = vst.msk [vmem:[%s320_s21 + $0x4] sm:$0xf] %vm590_vm12, %v715_v51 }
  0xef PF: > { %s17_s23 = sadd.s32 1, %s783_s23  }
  0xf0   : > { %p14_p4 = scmp.ge.s32.totalorder %s17_s23, 6  }
  0xf2   :  { %16 = sbr.rel (!%p14_p4) target bundleno = 2 (0x2), region = 83 }

// kernel: _pnet_forward_impl.4
= control target key start
LH: loop header
LB: loop body
LE: loop exit
PB: predicated region body
PF: predicated region fallthrough
CT: control target
= control target key end

     0   :  { %s453_s17 = smov 0   ;;  %s491_s0 = inlined_call_operand.vmem [shape: bf16[24,90], index: 0, kind: input, shape index: {}]   ;;  %s492_s1 = inlined_call_operand.vmem [shape: bf16[90,16], index: 1, kind: input, shape index: {}]   ;;  %s493_s2 = inlined_call_operand.vmem [shape: f32[1,16], index: 2, kind: input, shape index: {}]   ;;  %s494_s3 = inlined_call_operand.<no memory space> [shape: f32[1,1], index: 3, kind: input, shape index: {}]   ;;  %s495_s4 = inlined_call_operand.vmem [shape: bf16[24,16], index: 4, kind: output, shape index: {}]  }
   0x1   :  { %9 = sst [smem:[#allocation2]] %s494_s3 }
   0x2 LB: > { %s359_s18 = sadd.s32 4294967295, %s421_s17   ;;  %p363_p0 = scmp.ge.s32.totalorder %s421_s17, 1  ;;  %s421_s17 = sphi %s453_s17, %s15_s17  }
   0x3   : > { %p162_p1 = scmp.lt.s32.totalorder %s421_s17, 4 }
   0x5   : > { %p163_p2 = pnand %p363_p0, %p162_p1 }
   0x6   : > { %p186_p3 = scmp.lt.s32.totalorder (!%p163_p2), %s359_s18, 2  ;;  %s298_s8 = sld [smem:[#allocation2]] (!%p163_p2) }
   0x7   : > { %166 = sbr.rel (%p163_p2) target bundleno = 238 (0xee), region = 36 }
   0xc   : > { %vm254_vm0 = vcmask 1044480   ;;  %v423_v0 = vmov 0.0   ;;  %v409_v1 = vld [vmem:[%s492_s1 + $0x28] sm:$0x1f]   ;;  %vm424_vm1 = vmmov 0   ;;  %v410_v3 = vld [vmem:[%s492_s1 + $0x20] sm:$0xff]   ;;  %v300_v11 = vstv %s298_s8 }
   0xd   : > { %383 = vmatprep.subr.bf16.mxu0 %v423_v0  ;;  %v256_v2 = vsel %vm254_vm0, %v409_v1, 0  ;;  %395 = vmatprep.mubr.msk.bf16.mxu0 %vm424_vm1, %v423_v0  ;;  %v411_v4 = vld [vmem:[%s492_s1 + $0x18] sm:$0xff]   ;;  %v412_v5 = vld [vmem:[%s492_s1 + $0x10] sm:$0xff]   ;;  %s497_s18 = smov (!%p186_p3, %s359_s18), 2  ;;  %v413_v6 = vld [vmem:[%s492_s1 + $0x8] sm:$0xff]   ;;  %vm250_vm2 = vcmask 736256  }
   0xe   : > { %384 = vmatpush3.bf16.msra.mxu0 %v256_v2  ;;  %s364_s28 = sshll.u32 %s497_s18, 2  ;;  %v414_v7 = vld [vmem:[%s492_s1] sm:$0xff]   ;;  %vm304_vm4 = vcmask 125952  }
   0xf   : > { %385 = vmatprep.subr.bf16.mxu0 %v423_v0  ;;  %s189_s7 = scalar_lea.vmem %s491_s0, %s364_s28  ;;  %v366_v9 = vld [vmem:[%s493_s2] ss:$0 sm:$0xff]  ;;  %s193_s13 = scalar_lea.vmem %s495_s4, %s364_s28 }
  0x10   : > { %v195_v8 = vld [vmem:[%s189_s7] sm:$0xf] }
  0x12   : > { %386 = vmatpush3.bf16.msra.mxu0 %v410_v3 }
  0x13   : > { %387 = vmatprep.subr.bf16.mxu0 %v423_v0 }
  0x16   : > { %388 = vmatpush3.bf16.msra.mxu0 %v411_v4 }
  0x17   : > { %389 = vmatprep.subr.bf16.mxu0 %v423_v0 }
  0x1a   : > { %390 = vmatpush3.bf16.msra.mxu0 %v412_v5 }
  0x1b   : > { %391 = vmatprep.subr.bf16.mxu0 %v423_v0 }
  0x1e   : > { %392 = vmatpush3.bf16.msra.mxu0 %v413_v6 }
  0x1f   : > { %393 = vmatprep.subr.bf16.mxu0 %v423_v0 }
  0x22   : > { %394 = vmatpush3.bf16.msra.mxu0 %v414_v7 }
  0x25   : > { %396 = vmatmul.mubr.msk.bf16.vlgmr.msra.gmra.mxu0 %vm250_vm2, %v195_v8 }
  0xe5   : > { %v292_v10 = vpop.f32.mrf.mxu0 }
  0xe6   : > { %v293_v12 = vadd.f32 %v366_v9, %v292_v10 }
  0xe7   : > { %v397_v13 = vpop.f32.mrf.mxu0 }
  0xe8   : > { %vm299_vm3 = vcmp.gt.f32.partialorder %v293_v12, 0.0  ;;  %v301_v14 = vmul.f32 %v300_v11, %v293_v12 }
  0xe9   : > { %v295_v15 = vpop.f32.mrf.mxu0 }
  0xea   : > { %v302_v16 = vsel %vm299_vm3, %v293_v12, %v301_v14 }
  0xeb   : > { %v303_v17 = vpack.c.bf16 %v302_v16, %v302_v16  ;;  %v398_v18 = vpop.f32.mrf.mxu0 }
  0xed   : > { %305 = vst.msk [vmem:[%s193_s13] sm:$0xf] %vm304_vm4, %v303_v17 }
  0xee PF: > { %s15_s17 = sadd.s32 1, %s421_s17  }
  0xef   : > { %p12_p4 = scmp.ge.s32.totalorder %s15_s17, 5  }
  0xf1   :  { %14 = sbr.rel (!%p12_p4) target bundleno = 2 (0x2), region = 66 }

// kernel: _pnet_forward_impl.5
= control target key start
LH: loop header
LB: loop body
LE: loop exit
PB: predicated region body
PF: predicated region fallthrough
CT: control target
= control target key end

     0   :  { %v277_v0 = vmov 0   ;;  %vm111_vm0 = vcmask 130048   ;;  %v278_v14 = vmov 0.0   ;;  %vm279_vm1 = vmmov 0   ;;  %s365_s1 = inlined_call_operand.vmem [shape: bf16[144,32], index: 1, kind: input, shape index: {}]   ;;  %s366_s0 = inlined_call_operand.vmem [shape: bf16[8,144], index: 0, kind: input, shape index: {}]   ;;  %s367_s4 = inlined_call_operand.vmem [shape: bf16[32,16], index: 4, kind: input, shape index: {}]   ;;  %s368_s2 = inlined_call_operand.vmem [shape: f32[1,32], index: 2, kind: input, shape index: {}]   ;;  %s369_s3 = inlined_call_operand.<no memory space> [shape: f32[1,1], index: 3, kind: input, shape index: {}]   ;;  %s370_s5 = inlined_call_operand.vmem [shape: f32[1,16], index: 5, kind: input, shape index: {}]   ;;  %s371_s6 = inlined_call_operand.vmem [shape: f32[8,16], index: 6, kind: output, shape index: {}]  }
   0x1   :  { %115 = vmatprep.subr.bf16.mxu0 %v277_v0  ;;  %v264_v1 = vld [vmem:[%s365_s1 + $0x38] sm:$0xff]   ;;  %v265_v2 = vld [vmem:[%s365_s1 + $0x30] sm:$0xff]   ;;  %v266_v3 = vld [vmem:[%s365_s1 + $0x28] sm:$0xff]   ;;  %253 = vmatprep.subr.bf16.mxu1 %v278_v14  ;;  %v157_v18 = vstv %s369_s3  ;;  %vm184_vm3 = vcmask 261120  }
   0x2   :  { %116 = vmatpush1.bf16.msra.mxu0 %v264_v1  ;;  %v25_v4 = vld [vmem:[%s366_s0] sm:$0xff]  ;;  %v268_v7 = vld [vmem:[%s365_s1 + $0x18] sm:$0xff]   ;;  %v269_v8 = vld [vmem:[%s365_s1 + $0x10] sm:$0xff]   ;;  %257 = vmatprep.mubr.msk.bf16.mxu1 %vm279_vm1, %v278_v14 }
   0x3   :  { %117 = vmatprep.subr.bf16.mxu0 %v277_v0  ;;  %v267_v5 = vld [vmem:[%s365_s1 + $0x20] sm:$0xff]   ;;  %v235_v6 = vcombine.high %v25_v4, %v25_v4  ;;  %v270_v9 = vld [vmem:[%s365_s1 + $0x8] sm:$0xff]   ;;  %v234_v12 = vcombine.low %v25_v4, %v25_v4 }
   0x4   :  { %v271_v10 = vld [vmem:[%s365_s1] sm:$0xff]   ;;  %v275_v13 = vld [vmem:[%s367_s4 + $0x8] sm:$0xff]  }
   0x5   :  { %245 = vmatprep.mubr.msk.bf16.mxu0 %vm111_vm0, %v235_v6  ;;  %v272_v11 = vld [vmem:[%s365_s1 + $0x40] sm:$0xff]   ;;  %254 = vmatpush3.bf16.msra.mxu1 %v275_v13 }
   0x6   :  { %118 = vmatpush1.bf16.msra.mxu0 %v265_v2  ;;  %255 = vmatprep.subr.bf16.mxu1 %v278_v14  ;;  %v276_v15 = vld [vmem:[%s367_s4] sm:$0xff]  }
   0x7   :  { %119 = vmatprep.subr.bf16.mxu0 %v277_v0  ;;  %v233_v16 = vld [vmem:[%s368_s2] ss:$0 sm:$0xff] }
   0x8   :  { %v246_v26 = vld [vmem:[%s370_s5] ss:$0 sm:$0xff] }
   0x9   :  { %256 = vmatpush3.bf16.msra.mxu1 %v276_v15 }
   0xa   :  { %120 = vmatpush1.bf16.msra.mxu0 %v266_v3 }
   0xb   :  { %121 = vmatprep.subr.bf16.mxu0 %v277_v0 }
   0xe   :  { %122 = vmatpush1.bf16.msra.mxu0 %v267_v5 }
   0xf   :  { %123 = vmatprep.subr.bf16.mxu0 %v277_v0 }
  0x12   :  { %124 = vmatpush1.bf16.msra.mxu0 %v268_v7 }
  0x13   :  { %125 = vmatprep.subr.bf16.mxu0 %v277_v0 }
  0x16   :  { %126 = vmatpush1.bf16.msra.mxu0 %v269_v8 }
  0x17   :  { %127 = vmatprep.subr.bf16.mxu0 %v277_v0 }
  0x1a   :  { %128 = vmatpush1.bf16.msra.mxu0 %v270_v9 }
  0x1b   :  { %129 = vmatprep.subr.bf16.mxu0 %v277_v0 }
  0x1e   :  { %130 = vmatpush1.bf16.msra.mxu0 %v271_v10 }
  0x1f   :  { %145 = vmatprep.subr.bf16.mxu0 %v277_v0 }
  0x22   :  { %146 = vmatpush2.bf16.msra.mxu0 %v272_v11 }
  0x25   :  { %148 = vmatmul.mubr.bf16.vlgmr.msra.gmra.mxu0 %v234_v12 }
  0xe5   :  { %v149_v17 = vpop.f32.mrf.mxu0 }
  0xe6   :  { %v150_v19 = vadd.f32 %v233_v16, %v149_v17 }
  0xe7   :  { %v151_v20 = vpop.f32.mrf.mxu0 }
  0xe8   :  { %vm156_vm2 = vcmp.gt.f32.partialorder %v150_v19, 0.0  ;;  %v158_v21 = vmul.f32 %v157_v18, %v150_v19 }
  0xe9   :  { %v152_v22 = vpop.f32.mrf.mxu0 }
  0xea   :  { %v159_v23 = vsel %vm156_vm2, %v150_v19, %v158_v21 }
  0xeb   :  { %v160_v24 = vpack.c.bf16 %v159_v23, %v159_v23  ;;  %v153_v25 = vpop.f32.mrf.mxu0 }
  0xed   :  { %258 = vmatmul.mubr.msk.bf16.vlgmr.msra.gmra.mxu1 %vm184_vm3, %v160_v24 }
 0x1ad   :  { %v222_v27 = vpop.f32.mrf.mxu1 }
 0x1ae   :  { %v223_v28 = vadd.f32 %v246_v26, %v222_v27 }
 0x1af   :  { %v259_v29 = vpop.f32.mrf.mxu1 }
 0x1b0   :  { %228 = vst.msk [vmem:[%s371_s6] sm:$0xff] %vm111_vm0, %v223_v28 }
 0x1b1   :  { %v225_v30 = vpop.f32.mrf.mxu1 }
 0x1b3   :  { %v260_v31 = vpop.f32.mrf.mxu1 }

</bundles_post_ra>
